<compile_context>
chip_gen: v7x
topology: tpu7x:2x2x1
jax: 0.10.0
libtpu: 0.0.40
codegen_flags: <defaults>
</compile_context>

<pallas_src>
import jax
import jax.numpy as jnp
from jax.experimental import pallas as pl
from jax.experimental.pallas import tpu as pltpu


def _round_up(n, m):
    return ((n + m - 1) // m) * m


def dqn_kernel(x_ref, w1_ref, b1_ref, w2_ref, b2_ref, o_ref):
    # Layer 1: (TB, K) @ (K, H) on the MXU, bf16 inputs, f32 accumulation.
    x = x_ref[...].astype(jnp.bfloat16)
    h = jnp.dot(x, w1_ref[...], preferred_element_type=jnp.float32)
    h = jnp.maximum(h + b1_ref[...], 0.0)          # bias + ReLU in f32 (free VPU slots)
    # Layer 2: (TB, H) @ (H, 4) -> unpadded 4-wide output block.
    out = jnp.dot(h.astype(jnp.bfloat16), w2_ref[...],
                  preferred_element_type=jnp.float32)
    o_ref[...] = out + b2_ref[...]


def prepare_params(w1, b1, w2, b2):
    """One-time parameter prep (call once outside the RL hot loop)."""
    w1p = jnp.asarray(w1, jnp.bfloat16)                      # (K, H)
    w2p = jnp.asarray(w2, jnp.bfloat16)                      # (H, N)
    b1p = jnp.asarray(b1, jnp.float32).reshape(1, -1)        # (1, H)
    b2p = jnp.asarray(b2, jnp.float32).reshape(1, -1)        # (1, N)
    return w1p, b1p, w2p, b2p


def _batch_tiling(B, block_b):
    """Pick (tile_rows, num_tiles): bounded padding waste, >=2 tiles for v7x."""
    if B < 32:
        return B, 1                                   # one full-dim tile, no alignment needed
    n_tiles = max(pl.cdiv(B, block_b), 2)             # both v7x TensorCores get work
    tb = _round_up(pl.cdiv(B, n_tiles), 8)            # 8-row sublane alignment (f32)
    return tb, pl.cdiv(B, tb)                         # last tile may be partial (clipped DMA)


def dqn_forward(x, w1p, b1p, w2p, b2p, *, block_b=1024):
    """Batched DQN forward. x: (B, K) f32; w1p: (K, H) bf16; b1p: (1, H) f32;
    w2p: (H, N) bf16; b2p: (1, N) f32.  Returns (B, N) f32."""
    x = jnp.asarray(x, jnp.float32)
    B, K = x.shape
    K_w, H = w1p.shape
    assert K_w == K
    H_w, N = w2p.shape
    assert H_w == H

    TB, n_tiles = _batch_tiling(B, block_b)

    cost = pl.CostEstimate(
        flops=2 * B * (K * H + H * N),
        transcendentals=0,
        bytes_accessed=(4 * B * K                     # x stream (f32)
                        + 2 * (K * H + H * N)         # bf16 weights (resident, once)
                        + 4 * (H + N)                 # biases
                        + 4 * B * N),                 # output writeback
    )

    return pl.pallas_call(
        dqn_kernel,
        out_shape=jax.ShapeDtypeStruct((B, N), jnp.float32),
        grid=(n_tiles,),
        in_specs=[
            pl.BlockSpec((TB, K), lambda i: (i, 0)),   # x: streamed unpadded per batch tile
            pl.BlockSpec((K, H), lambda i: (0, 0)),    # params: constant index_map ->
            pl.BlockSpec((1, H), lambda i: (0, 0)),    #   DMA'd once, stay VMEM-resident
            pl.BlockSpec((H, N), lambda i: (0, 0)),
            pl.BlockSpec((1, N), lambda i: (0, 0)),
        ],
        out_specs=pl.BlockSpec((TB, N), lambda i: (i, 0)),   # unpadded 4-wide output
        compiler_params=pltpu.CompilerParams(
            dimension_semantics=("parallel",),         # batch tiles -> both TCs on v7x
        ),
        cost_estimate=cost,
    )(x, w1p, b1p, w2p, b2p)


def init_params(key, input_dim, hidden_dim=128, output_dim=4):
    # Deterministic synthetic init mirroring nn.Linear's U(-1/sqrt(fan_in), 1/sqrt(fan_in)).
    k1, k2, k3, k4 = jax.random.split(key, 4)
    bound1 = 1.0 / jnp.sqrt(input_dim)
    bound2 = 1.0 / jnp.sqrt(hidden_dim)
    w1 = jax.random.uniform(k1, (input_dim, hidden_dim), jnp.float32, -bound1, bound1)
    b1 = jax.random.uniform(k2, (1, hidden_dim), jnp.float32, -bound1, bound1)
    w2 = jax.random.uniform(k3, (hidden_dim, output_dim), jnp.float32, -bound2, bound2)
    b2 = jax.random.uniform(k4, (1, output_dim), jnp.float32, -bound2, bound2)
    return w1, b1, w2, b2


if __name__ == "__main__":
    key = jax.random.PRNGKey(0)
    kx1, kx2, kp = jax.random.split(key, 3)

    input_dim, hidden_dim, output_dim = 11, 128, 4   # snake state vector = 11 features

    w1, b1, w2, b2 = init_params(kp, input_dim, hidden_dim, output_dim)
    params = prepare_params(w1, b1, w2, b2)          # cast/reshape once, outside jit

    fwd = jax.jit(dqn_forward)

    def ref_fwd(xv):
        # Same math as the kernel: bf16 weights/activations, f32 accumulation.
        f32 = jnp.float32
        xb = xv.astype(jnp.bfloat16).astype(f32)
        h = jnp.maximum(xb @ params[0].astype(f32) + params[1], 0.0)
        return h.astype(jnp.bfloat16).astype(f32) @ params[2].astype(f32) + params[3]

    # Small batch: single full-dim tile.
    x_small = jax.random.normal(kx1, (4, input_dim), jnp.float32)
    out_small = jax.block_until_ready(fwd(x_small, *params))
    assert out_small.shape == (4, output_dim)
    assert jnp.allclose(out_small, ref_fwd(x_small), atol=2e-3, rtol=2e-3)

    # Moderate batch: two tiles incl. a partial last tile (exercises clipped DMA path).
    x_med = jax.random.normal(kx2, (40, input_dim), jnp.float32)
    out_med = jax.block_until_ready(fwd(x_med, *params))
    assert out_med.shape == (40, output_dim)
    assert jnp.allclose(out_med, ref_fwd(x_med), atol=2e-3, rtol=2e-3)

    print("KERNEL_OK")
</pallas_src>

<mosaic_0001>
module attributes {stable_mosaic.version = 11 : i64} {
  func.func @dqn_kernel(%arg0: i32, %arg1: memref<4x11xf32, #tpu.memory_space<vmem>>, %arg2: memref<11x128xbf16, #tpu.memory_space<vmem>>, %arg3: memref<1x128xf32, #tpu.memory_space<vmem>>, %arg4: memref<128x4xbf16, #tpu.memory_space<vmem>>, %arg5: memref<1x4xf32, #tpu.memory_space<vmem>>, %arg6: memref<4x4xf32, #tpu.memory_space<vmem>>) attributes {dimension_semantics = [#tpu.dimension_semantics<parallel>], iteration_bounds = array<i64: 1>, scalar_prefetch = 0 : i64, scratch_operands = 0 : i64, tpu.core_type = #tpu.core_type<tc>, window_params = [{transform_indices = @transform_0, window_bounds = array<i64: 4, 11>}, {pipeline_mode = #tpu.pipeline_mode<synchronous>, transform_indices = @transform_1, window_bounds = array<i64: 11, 128>}, {pipeline_mode = #tpu.pipeline_mode<synchronous>, transform_indices = @transform_2, window_bounds = array<i64: 1, 128>}, {pipeline_mode = #tpu.pipeline_mode<synchronous>, transform_indices = @transform_3, window_bounds = array<i64: 128, 4>}, {pipeline_mode = #tpu.pipeline_mode<synchronous>, transform_indices = @transform_4, window_bounds = array<i64: 1, 4>}, {transform_indices = @transform_5, window_bounds = array<i64: 4, 4>}]} {
    %c0 = arith.constant 0 : index
    %c0_0 = arith.constant 0 : index
    %0 = vector.load %arg1[%c0, %c0_0] : memref<4x11xf32, #tpu.memory_space<vmem>>, vector<4x11xf32>
    %1 = arith.truncf %0 : vector<4x11xf32> to vector<4x11xbf16>
    %c0_1 = arith.constant 0 : index
    %c0_2 = arith.constant 0 : index
    %2 = vector.load %arg2[%c0_1, %c0_2] : memref<11x128xbf16, #tpu.memory_space<vmem>>, vector<11x128xbf16>
    %cst = arith.constant dense<0.000000e+00> : vector<4x128xf32>
    %3 = tpu.matmul %1, %2, %cst {dimension_numbers = #tpu.dot_dimension_numbers<[1], [0], [0], [1], [0, 0, 1, 1], [], []>} : vector<4x11xbf16>, vector<11x128xbf16>, vector<4x128xf32> -> vector<4x128xf32>
    %c0_3 = arith.constant 0 : index
    %c0_4 = arith.constant 0 : index
    %4 = vector.load %arg3[%c0_3, %c0_4] : memref<1x128xf32, #tpu.memory_space<vmem>>, vector<1x128xf32>
    %5 = vector.broadcast %4 : vector<1x128xf32> to vector<4x128xf32>
    %6 = arith.addf %3, %5 : vector<4x128xf32>
    %cst_5 = arith.constant 0.000000e+00 : f32
    %7 = vector.broadcast %cst_5 : f32 to vector<4x128xf32>
    %8 = arith.maximumf %6, %7 : vector<4x128xf32>
    %9 = arith.truncf %8 : vector<4x128xf32> to vector<4x128xbf16>
    %c0_6 = arith.constant 0 : index
    %c0_7 = arith.constant 0 : index
    %10 = vector.load %arg4[%c0_6, %c0_7] : memref<128x4xbf16, #tpu.memory_space<vmem>>, vector<128x4xbf16>
    %cst_8 = arith.constant dense<0.000000e+00> : vector<4x4xf32>
    %11 = tpu.matmul %9, %10, %cst_8 {dimension_numbers = #tpu.dot_dimension_numbers<[1], [0], [0], [1], [0, 0, 1, 1], [], []>} : vector<4x128xbf16>, vector<128x4xbf16>, vector<4x4xf32> -> vector<4x4xf32>
    %c0_9 = arith.constant 0 : index
    %c0_10 = arith.constant 0 : index
    %12 = vector.load %arg5[%c0_9, %c0_10] : memref<1x4xf32, #tpu.memory_space<vmem>>, vector<1x4xf32>
    %13 = vector.broadcast %12 : vector<1x4xf32> to vector<4x4xf32>
    %14 = arith.addf %11, %13 : vector<4x4xf32>
    %c0_11 = arith.constant 0 : index
    %c0_12 = arith.constant 0 : index
    %15 = vector.load %arg6[%c0_11, %c0_12] : memref<4x4xf32, #tpu.memory_space<vmem>>, vector<4x4xf32>
    tpu.vector_store %arg6[%c0_11, %c0_12], %14 {strides = array<i32>} : memref<4x4xf32, #tpu.memory_space<vmem>>, vector<4x4xf32>,
    return
  }
  func.func @transform_0(%arg0: i32) -> (i32, i32) {
    %c0_i32 = arith.constant 0 : i32
    %c0_i32_0 = arith.constant 0 : i32
    return %arg0, %c0_i32 : i32, i32
  }
  func.func @transform_1(%arg0: i32) -> (i32, i32) {
    %c0_i32 = arith.constant 0 : i32
    %c0_i32_0 = arith.constant 0 : i32
    %c0_i32_1 = arith.constant 0 : i32
    return %c0_i32, %c0_i32_0 : i32, i32
  }
  func.func @transform_2(%arg0: i32) -> (i32, i32) {
    %c0_i32 = arith.constant 0 : i32
    %c0_i32_0 = arith.constant 0 : i32
    %c0_i32_1 = arith.constant 0 : i32
    return %c0_i32, %c0_i32_0 : i32, i32
  }
  func.func @transform_3(%arg0: i32) -> (i32, i32) {
    %c0_i32 = arith.constant 0 : i32
    %c0_i32_0 = arith.constant 0 : i32
    %c0_i32_1 = arith.constant 0 : i32
    return %c0_i32, %c0_i32_0 : i32, i32
  }
  func.func @transform_4(%arg0: i32) -> (i32, i32) {
    %c0_i32 = arith.constant 0 : i32
    %c0_i32_0 = arith.constant 0 : i32
    %c0_i32_1 = arith.constant 0 : i32
    return %c0_i32, %c0_i32_0 : i32, i32
  }
  func.func @transform_5(%arg0: i32) -> (i32, i32) {
    %c0_i32 = arith.constant 0 : i32
    %c0_i32_0 = arith.constant 0 : i32
    return %arg0, %c0_i32 : i32, i32
  }
}

</mosaic_0001>

<bundles_post_ra>
// kernel: dqn_forward.1
= control target key start
LH: loop header
LB: loop body
LE: loop exit
PB: predicated region body
PF: predicated region fallthrough
CT: control target
= control target key end

     0   :  { %vm42_vm0 = vcmask 1044480   ;;  %v304_v0 = vmov 0.0   ;;  %vm43_vm1 = vcmask 1045504   ;;  %v305_v2 = vmov 65535   ;;  %s386_s0 = inlined_call_operand.vmem [shape: f32[4,11], index: 0, kind: input, shape index: {}]   ;;  %s387_s1 = inlined_call_operand.vmem [shape: bf16[11,128], index: 1, kind: input, shape index: {}]   ;;  %s388_s2 = inlined_call_operand.vmem [shape: f32[1,128], index: 2, kind: input, shape index: {}]   ;;  %s389_s3 = inlined_call_operand.vmem [shape: bf16[128,4], index: 3, kind: input, shape index: {}]   ;;  %s390_s4 = inlined_call_operand.vmem [shape: f32[1,4], index: 4, kind: input, shape index: {}]   ;;  %s391_s5 = inlined_call_operand.hbm [shape: f32[4,4], index: 5, kind: output, shape index: {}]  }
   0x1   :  { %241 = vmatprep.subr.bf16.mxu0 %v304_v0  ;;  %v271_v1 = vld [vmem:[%s387_s1] sm:$0x3f]   ;;  %247 = vmatprep.subr.bf16.mxu1 %v304_v0  ;;  %v44_v3 = vsel %vm42_vm0, 4294967295, %v305_v2  ;;  %vm306_vm2 = vmmov 0   ;;  %v273_v7 = vld [vmem:[%s389_s3 + $0x8] sm:$0xff]   ;;  %vm38_vm3 = vcmask 89088  }
   0x2   :  { %243 = vmatprep.mubr.msk.bf16.mxu0 %vm306_vm2, %v304_v0  ;;  %v22_v4 = vld [vmem:[%s386_s0] sm:$0xf]  ;;  %263 = vmatprep.mubr.msk.bf16.mxu1 %vm306_vm2, %v304_v0  ;;  %v45_v6 = vsel %vm43_vm1, %v44_v3, 0  ;;  %v274_v10 = vld [vmem:[%s389_s3 + $0x10] sm:$0xff]  }
   0x3   :  { %v272_v5 = vld [vmem:[%s389_s3] sm:$0xff]   ;;  %v47_v8 = vand.u32 %v271_v1, %v45_v6  ;;  %v23_v9 = vpack.c.bf16 %v22_v4, %v22_v4 }
   0x4   :  { %248 = vmatpush3.bf16.msra.mxu1 %v272_v5 }
   0x5   :  { %249 = vmatprep.subr.bf16.mxu1 %v304_v0  ;;  %242 = vmatpush3.bf16.msra.mxu0 %v47_v8 }
   0x8   :  { %250 = vmatpush3.bf16.msra.mxu1 %v273_v7  ;;  %244 = vmatmul.mubr.msk.bf16.vlgmr.msra.gmra.mrb[0].mxu0 %vm38_vm3, %v23_v9 }
   0x9   :  { %251 = vmatprep.subr.bf16.mxu1 %v304_v0 }
   0xa   :  { %10 = vsyncpa [#allocation3], 0  ;;  %v275_v11 = vld [vmem:[%s389_s3 + $0x18] sm:$0xff]   ;;  %v276_v12 = vld [vmem:[%s389_s3 + $0x20] sm:$0xff]   ;;  %s307_s15 = smov [#allocation2]   ;;  %vm202_vm4 = vcmask 27648  }
   0xb   :  { %v277_v13 = vld [vmem:[%s389_s3 + $0x28] sm:$0xff]   ;;  %v278_v14 = vld [vmem:[%s389_s3 + $0x30] sm:$0xff]   ;;  %v279_v15 = vld [vmem:[%s389_s3 + $0x38] sm:$0xff]   ;;  %s210_s16 = sshll.u32 %s307_s15, 4  ;;  %s211_s16 = int_to_ptr.vmem [resolvable:$true] %s210_s16 }
   0xc   :  { %252 = vmatpush3.bf16.msra.mxu1 %v274_v10  ;;  %v218_v16 = vld [vmem:[%s388_s2] ss:$0 sm:$0xff]  ;;  %s280_s2 = scalar_lea.vmem %s211_s16, 64  ;;  %p285_p1 = scmp.lt.s32.totalorder %s211_s16, %s211_s16 }
   0xd   :  { %253 = vmatprep.subr.bf16.mxu1 %v304_v0  ;;  %v221_v24 = vld [vmem:[%s390_s4] ss:$0 sm:$0xff]  ;;  %p281_p0 = scmp.ne.s32.totalorder %s211_s16, %s280_s2  ;;  %p286_p2 = scmp.lt.s32.totalorder %s280_s2, %s280_s2 }
   0xf   :  { %p287_p3 = por %p286_p2, %p285_p1 }
  0x10   :  { %254 = vmatpush3.bf16.msra.mxu1 %v275_v11 }
  0x11   :  { %255 = vmatprep.subr.bf16.mxu1 %v304_v0  ;;  %p288_p4 = pnand %p287_p3, %p281_p0 }
  0x14   :  { %256 = vmatpush3.bf16.msra.mxu1 %v276_v12 }
  0x15   :  { %257 = vmatprep.subr.bf16.mxu1 %v304_v0 }
  0x18   :  { %258 = vmatpush3.bf16.msra.mxu1 %v277_v13 }
  0x19   :  { %259 = vmatprep.subr.bf16.mxu1 %v304_v0 }
  0x1c   :  { %260 = vmatpush3.bf16.msra.mxu1 %v278_v14 }
  0x1d   :  { %261 = vmatprep.subr.bf16.mxu1 %v304_v0 }
  0x20   :  { %262 = vmatpush3.bf16.msra.mxu1 %v279_v15 }
  0xdb   :  { %v83_v17 = vpop.f32.mrb[0].mxu0 }
  0xdc   :  { %v84_v18 = vadd.f32 %v218_v16, %v83_v17  ;;  %v245_v19 = vpop.f32.mrb[1].mxu0 }
  0xdd   :  { %v86_v20 = vpop.f32.mrb[2].mxu0 }
  0xde   :  { %v89_v21 = vmax.f32 %v84_v18, 0.0  ;;  %v246_v22 = vpop.f32.mrb[3].mxu0 }
  0xe0   :  { %v90_v23 = vpack.c.bf16 %v89_v21, %v89_v21 }
  0xe2   :  { %264 = vmatmul.mubr.bf16.vlgmr.msra.gmra.mrb[0].mxu1 %v90_v23 }
 0x1b5   :  { %v196_v25 = vpop.f32.mrb[0].mxu1 }
 0x1b6   :  { %v197_v26 = vadd.f32 %v221_v24, %v196_v25  ;;  %v265_v27 = vpop.f32.mrb[1].mxu1 }
 0x1b7   :  { %v199_v28 = vpop.f32.mrb[2].mxu1 }
 0x1b8   :  { %v266_v29 = vpop.f32.mrb[3].mxu1  ;;  %203 = vst.msk [vmem:[#allocation2] sm:$0xf] %vm202_vm4, %v197_v26 }
 0x1b9   :  { %291 = shalt.err (!%p288_p4)
}
 0x1ba   :  { %s292_s4 = scalar_lea.hbm %s391_s5, 64 }
 0x1bb   :  { %p293_p5 = scmp.ne.s32.totalorder %s391_s5, %s292_s4  ;;  %p296_p6 = scmp.lt.u32.totalorder %s292_s4, %s391_s5 }
 0x1bd   :  { %p298_p7 = pnand %p296_p6, %p293_p5 }
 0x1bf   :  { %301 = shalt.err (!%p298_p7)
}
 0x1c0   :  { %213 = dma.vmem_to_hbm [thread:$0]  %s211_s16, 64, %s391_s5, [#allocation3]  }
 0x1c1   :  { %302 = dma.done.wait [#allocation3], 64  }
 0x1c2   :  { %303 = vsyncadd [#allocation3], 4294967232 }
 0x1c3   :  { %217 = vsyncpa [#allocation3], 1 }

</bundles_post_ra>
